<compile_context>
chip_gen: v7x
topology: tpu7x:2x2x1
jax: 0.10.0
libtpu: 0.0.40
codegen_flags: <defaults>
</compile_context>

<pallas_src>
import functools

import jax
import jax.numpy as jnp
from jax.experimental import pallas as pl
from jax.experimental.pallas import tpu as pltpu


# ----------------------------- Pallas LayerNorm kernel -----------------------------

def _layernorm_kernel(x_ref, a_ref, b_ref, o_ref, *, eps, d):
    # x_ref: (TR, D) rows of tokens      a_ref/b_ref: (1, D) scale/shift
    x = x_ref[...].astype(jnp.float32)                                # (TR, D)
    mean = jnp.mean(x, axis=-1, keepdims=True)                        # (TR, 1)
    xc = x - mean
    # torch.Tensor.std() is unbiased (ddof = 1)
    var = jnp.sum(xc * xc, axis=-1, keepdims=True) / (d - 1)          # (TR, 1)
    std = jnp.sqrt(var)
    y = a_ref[...] * (xc / (std + eps)) + b_ref[...]                  # (TR, D)
    o_ref[...] = y.astype(o_ref.dtype)


def layernorm_forward(x2d, a_2, b_2, *, eps=1e-6, block_rows=None):
    """x2d: (T, D) f32.  a_2, b_2: (D,) f32.  Returns (T, D) f32 (PyTorch LayerNorm-as-in-spec)."""
    T, D = x2d.shape
    assert D > 1, "unbiased std needs D > 1"

    if block_rows is None:
        # Large tiles when there is enough work; >=2 grid steps so v7x megacore can split rows.
        block_rows = 128 if T >= 256 else 8

    Tp = pl.cdiv(T, block_rows) * block_rows
    if Tp != T:
        # Padded rows are all-zero -> std=0 -> finite output (sliced off below).
        x2d = jnp.pad(x2d, ((0, Tp - T), (0, 0)))

    a2 = a_2.reshape(1, D).astype(jnp.float32)
    b2 = b_2.reshape(1, D).astype(jnp.float32)

    kernel = functools.partial(_layernorm_kernel, eps=eps, d=D)

    out = pl.pallas_call(
        kernel,
        out_shape=jax.ShapeDtypeStruct((Tp, D), jnp.float32),
        grid_spec=pltpu.PrefetchScalarGridSpec(
            num_scalar_prefetch=0,
            grid=(Tp // block_rows,),
            in_specs=[
                pl.BlockSpec((block_rows, D), lambda i: (i, 0)),   # token rows
                pl.BlockSpec((1, D), lambda i: (0, 0)),            # a_2 (gamma)
                pl.BlockSpec((1, D), lambda i: (0, 0)),            # b_2 (beta)
            ],
            out_specs=pl.BlockSpec((block_rows, D), lambda i: (i, 0)),
        ),
        compiler_params=pltpu.CompilerParams(
            dimension_semantics=("parallel",)),
    )(x2d, a2, b2)

    return out[:T]


# --------------------------------- Decoder forward ----------------------------------

def decoder_forward(x, memory, src_mask, tgt_mask, *, layers, norm_a, norm_b, eps=1e-6):
    """Mirrors Decoder.forward: apply each layer, then the final LayerNorm (Pallas kernel)."""
    # TODO(synk): DecoderLayer internals (self-attn / src-attn / feed-forward) are not defined
    # in this module spec; `layers` are opaque callables, exactly like clones(layer, N).
    for layer in layers:
        x = layer(x, memory, src_mask, tgt_mask)
    B, S, D = x.shape
    y = layernorm_forward(x.reshape(B * S, D), norm_a, norm_b, eps=eps)
    return y.reshape(B, S, D)


# -------------------------------------- demo ----------------------------------------

if __name__ == "__main__":
    B, S, D, N = 2, 8, 32, 2
    eps = 1e-6

    key = jax.random.PRNGKey(0)
    kx, km, ka, kb = jax.random.split(key, 4)

    x = jax.random.normal(kx, (B, S, D), dtype=jnp.float32)
    memory = jax.random.normal(km, (B, S, D), dtype=jnp.float32)
    src_mask = jnp.ones((B, 1, S), dtype=jnp.float32)
    tgt_mask = jnp.tril(jnp.ones((S, S), dtype=jnp.float32))[None]

    # LayerNorm params (torch init is ones/zeros; perturb to exercise the affine path).
    a_2 = 1.0 + 0.1 * jax.random.normal(ka, (D,), dtype=jnp.float32)
    b_2 = 0.1 * jax.random.normal(kb, (D,), dtype=jnp.float32)

    # Opaque decoder layers (spec does not define DecoderLayer) -- identity stand-ins.
    layers = [lambda x, memory, src_mask, tgt_mask: x for _ in range(N)]

    out = decoder_forward(x, memory, src_mask, tgt_mask,
                          layers=layers, norm_a=a_2, norm_b=b_2, eps=eps)
    out = jax.block_until_ready(out)

    # Pure-JAX reference mirroring the PyTorch module exactly.
    xr = x
    for layer in layers:
        xr = layer(xr, memory, src_mask, tgt_mask)
    mean = xr.mean(-1, keepdims=True)
    std = jnp.sqrt(jnp.sum((xr - mean) ** 2, axis=-1, keepdims=True) / (D - 1))  # unbiased
    ref = a_2 * (xr - mean) / (std + eps) + b_2

    assert out.shape == (B, S, D)
    assert jnp.allclose(out, ref, atol=1e-5, rtol=1e-5), "mismatch vs reference"

    print("KERNEL_OK")
</pallas_src>

<mosaic_0001>
module attributes {stable_mosaic.version = 11 : i64} {
  func.func @_layernorm_kernel(%arg0: i32, %arg1: memref<8x32xf32, #tpu.memory_space<vmem>>, %arg2: memref<1x32xf32, #tpu.memory_space<vmem>>, %arg3: memref<1x32xf32, #tpu.memory_space<vmem>>, %arg4: memref<8x32xf32, #tpu.memory_space<vmem>>) attributes {dimension_semantics = [#tpu.dimension_semantics<parallel>], iteration_bounds = array<i64: 2>, scalar_prefetch = 0 : i64, scratch_operands = 0 : i64, tpu.core_type = #tpu.core_type<tc>, window_params = [{transform_indices = @transform_0, window_bounds = array<i64: 8, 32>}, {pipeline_mode = #tpu.pipeline_mode<synchronous>, transform_indices = @transform_1, window_bounds = array<i64: 1, 32>}, {pipeline_mode = #tpu.pipeline_mode<synchronous>, transform_indices = @transform_2, window_bounds = array<i64: 1, 32>}, {transform_indices = @transform_3, window_bounds = array<i64: 8, 32>}]} {
    %c0 = arith.constant 0 : index
    %c0_0 = arith.constant 0 : index
    %0 = vector.load %arg1[%c0, %c0_0] : memref<8x32xf32, #tpu.memory_space<vmem>>, vector<8x32xf32>
    %cst = arith.constant dense<0.000000e+00> : vector<8xf32>
    %1 = vector.multi_reduction <add>, %0, %cst [1] : vector<8x32xf32> to vector<8xf32>
    %2 = vector.shape_cast %1 : vector<8xf32> to vector<8x1xf32>
    %cst_1 = arith.constant 3.200000e+01 : f32
    %3 = vector.broadcast %cst_1 : f32 to vector<8x1xf32>
    %4 = arith.divf %2, %3 : vector<8x1xf32>
    %5 = vector.broadcast %4 : vector<8x1xf32> to vector<8x32xf32>
    %6 = arith.subf %0, %5 : vector<8x32xf32>
    %7 = arith.mulf %6, %6 : vector<8x32xf32>
    %cst_2 = arith.constant dense<0.000000e+00> : vector<8xf32>
    %8 = vector.multi_reduction <add>, %7, %cst_2 [1] : vector<8x32xf32> to vector<8xf32>
    %9 = vector.shape_cast %8 : vector<8xf32> to vector<8x1xf32>
    %cst_3 = arith.constant 3.100000e+01 : f32
    %10 = vector.broadcast %cst_3 : f32 to vector<8x1xf32>
    %11 = arith.divf %9, %10 : vector<8x1xf32>
    %12 = math.sqrt %11 : vector<8x1xf32>
    %c0_4 = arith.constant 0 : index
    %c0_5 = arith.constant 0 : index
    %13 = vector.load %arg2[%c0_4, %c0_5] : memref<1x32xf32, #tpu.memory_space<vmem>>, vector<1x32xf32>
    %cst_6 = arith.constant 9.99999997E-7 : f32
    %14 = vector.broadcast %cst_6 : f32 to vector<8x1xf32>
    %15 = arith.addf %12, %14 : vector<8x1xf32>
    %16 = vector.broadcast %15 : vector<8x1xf32> to vector<8x32xf32>
    %17 = arith.divf %6, %16 : vector<8x32xf32>
    %18 = vector.broadcast %13 : vector<1x32xf32> to vector<8x32xf32>
    %19 = arith.mulf %18, %17 : vector<8x32xf32>
    %c0_7 = arith.constant 0 : index
    %c0_8 = arith.constant 0 : index
    %20 = vector.load %arg3[%c0_7, %c0_8] : memref<1x32xf32, #tpu.memory_space<vmem>>, vector<1x32xf32>
    %21 = vector.broadcast %20 : vector<1x32xf32> to vector<8x32xf32>
    %22 = arith.addf %19, %21 : vector<8x32xf32>
    %c0_9 = arith.constant 0 : index
    %c0_10 = arith.constant 0 : index
    %23 = vector.load %arg4[%c0_9, %c0_10] : memref<8x32xf32, #tpu.memory_space<vmem>>, vector<8x32xf32>
    tpu.vector_store %arg4[%c0_9, %c0_10], %22 {strides = array<i32>} : memref<8x32xf32, #tpu.memory_space<vmem>>, vector<8x32xf32>,
    return
  }
  func.func @transform_0(%arg0: i32) -> (i32, i32) {
    %c0_i32 = arith.constant 0 : i32
    %c0_i32_0 = arith.constant 0 : i32
    return %arg0, %c0_i32 : i32, i32
  }
  func.func @transform_1(%arg0: i32) -> (i32, i32) {
    %c0_i32 = arith.constant 0 : i32
    %c0_i32_0 = arith.constant 0 : i32
    %c0_i32_1 = arith.constant 0 : i32
    return %c0_i32, %c0_i32_0 : i32, i32
  }
  func.func @transform_2(%arg0: i32) -> (i32, i32) {
    %c0_i32 = arith.constant 0 : i32
    %c0_i32_0 = arith.constant 0 : i32
    %c0_i32_1 = arith.constant 0 : i32
    return %c0_i32, %c0_i32_0 : i32, i32
  }
  func.func @transform_3(%arg0: i32) -> (i32, i32) {
    %c0_i32 = arith.constant 0 : i32
    %c0_i32_0 = arith.constant 0 : i32
    return %arg0, %c0_i32 : i32, i32
  }
}

</mosaic_0001>

<bundles_post_ra>
// kernel: tpu_custom_call.1
= control target key start
LH: loop header
LB: loop body
LE: loop exit
PB: predicated region body
PF: predicated region fallthrough
CT: control target
= control target key end

     0   :  { %8 = vsyncpa [#allocation3], 0  ;;  %s669_s0 = inlined_call_operand.hbm [shape: f32[16,32], index: 0, kind: input, shape index: {}]   ;;  %s670_s1 = inlined_call_operand.vmem [shape: f32[1,32], index: 1, kind: input, shape index: {}]   ;;  %s671_s2 = inlined_call_operand.vmem [shape: f32[1,32], index: 2, kind: input, shape index: {}]   ;;  %s672_s3 = inlined_call_operand.hbm [shape: f32[16,32], index: 3, kind: output, shape index: {}]  }
   0x1   :  { %10 = vsyncpa [#allocation3 + $0x1], 0 }
   0x2   :  { %11 = vsyncpa [#allocation4], 0 }
   0x3   :  { %13 = vsyncpa [#allocation4 + $0x1], 0  ;;  %s495_s12 = smov 0   ;;  %s497_s13 = smov 0  }
   0x4   :  { %s499_s14 = smov 0   ;;  %s501_s15 = smov 0  }
   0x5 LB: > { %s516_s16 = sadd.s32 4294967295, %s471_s15   ;;  %s311_s17 = sadd.s32 4294967294, %s471_s15   ;;  %s471_s15 = sphi %s501_s15, %s687_s15   ;;  %s467_s14 = sphi %s499_s14, %s686_s14   ;;  %s463_s13 = sphi %s497_s13, %s685_s13   ;;  %s459_s12 = sphi %s495_s12, %s684_s12  }
   0x6   : > { %s520_s18 = sadd.s32 1, %s471_s15   ;;  %s26_s19 = sadd.s32 1, %s467_s14 }
   0x7   : > { %s23_s20 = ssub.s32 %s471_s15, %s520_s18  ;;  %p33_p0 = scmp.ne.s32.totalorder %s467_s14, %s463_s13 }
   0x8   : > { %p24_p1 = scmp.eq.s32.totalorder %s23_s20, 0  ;;  %p34_p2 = scmp.eq.s32.totalorder %s471_s15, 0 }
   0x9   : > { %p39_p3 = scmp.ne.s32.totalorder %s463_s13, %s459_s12  ;;  %p40_p4 = scmp.eq.s32.totalorder %s516_s16, 0 }
   0xa   : > { %s532_s21 = scalar_select %p24_p1, %s467_s14, %s26_s19  }
   0xb   : > { %p534_p5 = por %p34_p2, %p33_p0  ;;  %p538_p6 = por %p40_p4, %p39_p3 }
   0xc   : > { %p105_p7 = scmp.eq.s32.totalorder %s516_s16, 1  ;;  %p111_p8 = scmp.eq.s32.totalorder %s311_s17, 1 }
   0xd   : > { %p337_p10 = scmp.lt.s32.totalorder %s471_s15, 2  ;;  %s137_s26 = sand.u32 1, %s467_s14  }
   0xe   : > { %p545_p11 = por %p105_p7, %p33_p0  ;;  %p549_p12 = por %p111_p8, %p39_p3 }
   0xf   : > { %s315_s27 = sshll.u32 %s471_s15, 7  ;;  %s314_s28 = sshll.u32 %s137_s26, 3 }
  0x10   : > { %s676_s24 = scalar_select %p545_p11, 1, 0 }
  0x11   : > { %s677_s25 = scalar_select %p549_p12, 1, 0 }
  0x12   : > { %s558_s4 = scalar_lea.hbm %s669_s0, %s315_s27  ;;  %s141_s5 = scalar_lea.vmem [#allocation2], %s314_s28 }
  0x13   : > { %s148_s6 = sshll.u32 %s141_s5, 4  ;;  %p562_p13 = pnand %p337_p10, %p534_p5  ;;  %s566_s6 = int_to_ptr.vmem [resolvable:$true] %s148_s6 }
  0x14   : > { %s138_s8 = scalar_lea.sflag [#allocation3], %s137_s26  ;;  %s375_s9 = scalar_lea.hbm %s558_s4, 128 }
  0x15   : > { %p376_p2 = scmp.ne.s32.totalorder %s558_s4, %s375_s9  ;;  %p377_p3 = pneg %p562_p13 }
  0x16   : > { %s380_s17 = scalar_lea.hbm %s669_s0, 256  ;;  %p381_p5 = scmp.lt.u32.totalorder %s558_s4, %s669_s0 }
  0x17   : > { %p378_p4 = pnand %p377_p3, %p376_p2  ;;  %p382_p8 = scmp.lt.u32.totalorder %s380_s17, %s375_s9 }
  0x18   : > { %p384_p9 = scmp.lt.u32.totalorder %s375_s9, %s558_s4 }
  0x19   : > { %p379_p7 = pneg %p378_p4  ;;  %p383_p10 = por %p382_p8, %p381_p5 }
  0x1b   : > { %p385_p0 = por %p384_p9, %p383_p10 }
  0x1d   : > { %p386_p1 = pnand %p385_p0, %p379_p7 }
  0x1f   : > { %389 = shalt.err (!%p386_p1)
}
  0x20   : > { %s390_s22 = scalar_lea.vmem %s566_s6, 128  ;;  %s473_s26 = smov [#allocation2]  }
  0x21   : > { %p391_p2 = scmp.ne.s32.totalorder %s566_s6, %s390_s22  ;;  %s395_s27 = sshll.u32 %s473_s26, 4  ;;  %s396_s27 = int_to_ptr.vmem [resolvable:$false] %s395_s27 }
  0x22   : > { %s397_s28 = scalar_lea.vmem %s396_s27, 256  ;;  %p398_p11 = scmp.lt.s32.totalorder %s566_s6, %s396_s27 }
  0x23   : > { %p393_p4 = pnand %p391_p2, %p377_p3  ;;  %p399_p5 = scmp.lt.s32.totalorder %s397_s28, %s390_s22 }
  0x25   : > { %p394_p12 = pneg %p393_p4  ;;  %p400_p8 = por %p399_p5, %p398_p11 }
  0x27   : > { %p401_p9 = pnand %p400_p8, %p394_p12 }
  0x29   : > { %404 = shalt.err (!%p401_p9)
}
  0x2a   : > { %332 = dma.hbm_to_vmem [thread:$0]  (!%p562_p13), %s558_s4, 128, %s566_s6, %s138_s8  }
  0x2b   : > { %p679_p0 = scmp.lt.s32.totalorder %s471_s15, 3  ;;  %p680_p1 = scmp.ge.s32.totalorder %s471_s15, 1 }
  0x2d   : > { %p154_p3 = pnand %p680_p1, %p679_p0 }
  0x2e   : > { %s600_s29 = sand.u32 (!%p154_p3), 1, %s463_s13  }
  0x2f   : > { %157 = sbr.rel (%p154_p3) target bundleno = 398 (0x18e), region = 32  ;;  %s317_s30 = sshll.u32 (!%p154_p3), %s600_s29, 3 }
  0x30   : > { %s160_s5 = scalar_lea.sflag (!%p154_p3), [#allocation3], %s600_s29  ;;  %s163_s7 = scalar_lea.vmem (!%p154_p3), [#allocation2], %s317_s30 }
  0x36   : > { %450 = dma.done.wait (%p538_p6), %s160_s5, 128  }
  0x37   : > { %452 = vsyncadd (%p538_p6), %s160_s5, 4294967168  ;;  %vm187_vm0 = vcmask 261120   ;;  %v186_v0 = vld [vmem:[%s163_s7] sm:$0xff]  ;;  %s322_s9 = sshll.u32 %s516_s16, 7  ;;  %s185_s10 = scalar_lea.vmem [#allocation5], %s317_s30 }
  0x38   : > { %v188_v1 = vsel %vm187_vm0, %v186_v0, 0.0  ;;  %v319_v16 = vld [vmem:[%s670_s1] ss:$0 sm:$0xff]  ;;  %s241_s11 = sshll.u32 %s185_s10, 4  ;;  %s624_s20 = scalar_lea.hbm %s672_s3, %s322_s9  ;;  %s626_s11 = int_to_ptr.vmem [resolvable:$true] %s241_s11 }
  0x39   : > { %189 = vadd.xlane.f32.xlu0 %v188_v1  ;;  %v320_v18 = vld [vmem:[%s671_s2] ss:$0 sm:$0xff]  ;;  %s228_s22 = scalar_lea.sflag [#allocation4], %s600_s29  ;;  %s405_s26 = scalar_lea.vmem %s626_s11, 128 }
  0x3a   : > { %p406_p6 = scmp.ne.s32.totalorder %s626_s11, %s405_s26  ;;  %p681_p11 = scmp.ne.s32.totalorder %s676_s24, 0 }
  0x3b   : > { %s474_s16 = smov [#allocation5]  }
  0x3c   : > { %p407_p12 = pnand %p406_p6, %p681_p11  ;;  %s409_s27 = sshll.u32 %s474_s16, 4  ;;  %s410_s27 = int_to_ptr.vmem [resolvable:$false] %s409_s27 }
  0x3d   : > { %s411_s28 = scalar_lea.vmem %s410_s27, 256  ;;  %p412_p7 = scmp.lt.s32.totalorder %s626_s11, %s410_s27 }
  0x3e   : > { %p408_p13 = pneg %p407_p12  ;;  %p413_p10 = scmp.lt.s32.totalorder %s411_s28, %s405_s26 }
  0x40   : > { %p414_p2 = por %p413_p10, %p412_p7 }
  0x42   : > { %p415_p4 = pnand %p414_p2, %p408_p13 }
  0xc6   : > { %v190_v2 = vpop.xlane.xlu0 %189 }
  0xc7   : > { %v192_v3 = vmul.f32 0.03125, %v190_v2 }
  0xc9   : > { %v193_v4 = vsub.f32 %v186_v0, %v192_v3 }
  0xcb   : > { %v194_v5 = vmul.f32 %v193_v4, %v193_v4 }
  0xcd   : > { %v195_v6 = vsel %vm187_vm0, %v194_v5, 0.0 }
  0xce   : > { %196 = vadd.xlane.f32.xlu0 %v195_v6 }
 0x15b   : > { %v197_v7 = vpop.xlane.xlu0 %196 }
 0x15c   : > { %v199_v8 = vmul.f32 0.032258064, %v197_v7 }
 0x15e   : > { %371 = vrsqrt.f32 %v199_v8  ;;  %vm202_vm1 = vcmp.eq.f32.partialorder %v199_v8, inf  ;;  %v205_v11 = vand.u32 2147483648, %v199_v8  ;;  %vm204_vm2 = vcmp.eq.f32.partialorder %v199_v8, 0.0 }
 0x168   : > { %v372_v9 = vpop.eup %371 }
 0x169   : > { %v201_v10 = vmul.f32 %v372_v9, %v199_v8 }
 0x16b   : > { %v203_v12 = vsel %vm202_vm1, %v199_v8, %v201_v10 }
 0x16c   : > { %v206_v13 = vsel %vm204_vm2, %v205_v11, %v203_v12 }
 0x16d   : > { %v208_v14 = vadd.f32 1e-06, %v206_v13 }
 0x16f   : > { %373 = vrcp.f32 %v208_v14 }
 0x179   : > { %v374_v15 = vpop.eup %373 }
 0x17a   : > { %v210_v17 = vmul.f32 %v374_v15, %v193_v4 }
 0x17c   : > { %v217_v19 = vmul.f32 %v319_v16, %v210_v17 }
 0x17e   : > { %v225_v20 = vadd.f32 %v320_v18, %v217_v19 }
 0x180   : > { %226 = vst.msk [vmem:[%s185_s10] sm:$0xff] %vm187_vm0, %v225_v20 }
 0x181   : > { %418 = shalt.err (!%p415_p4)
}
 0x182   : > { %s419_s29 = scalar_lea.hbm %s624_s20, 128  ;;  %s423_s7 = scalar_lea.hbm %s672_s3, 256 }
 0x183   : > { %p420_p5 = scmp.ne.s32.totalorder %s624_s20, %s419_s29  ;;  %p424_p0 = scmp.lt.u32.totalorder %s624_s20, %s672_s3 }
 0x184   : > { %p425_p1 = scmp.lt.u32.totalorder %s423_s7, %s419_s29  ;;  %p427_p6 = scmp.lt.u32.totalorder %s419_s29, %s624_s20 }
 0x185   : > { %p421_p8 = pnand %p420_p5, %p681_p11 }
 0x186   : > { %p426_p3 = por %p425_p1, %p424_p0 }
 0x187   : > { %p422_p9 = pneg %p421_p8 }
 0x188   : > { %p428_p12 = por %p427_p6, %p426_p3 }
 0x18a   : > { %p429_p13 = pnand %p428_p12, %p422_p9 }
 0x18c   : > { %432 = shalt.err (!%p429_p13)
}
 0x18d   : > { %327 = dma.vmem_to_hbm [thread:$0]  (%p681_p11), %s626_s11, 128, %s624_s20, %s228_s22  }
 0x18e PF: > { %s253_s6 = sand.u32 1, %s459_s12   ;;  %p682_p7 = scmp.ne.s32.totalorder %s677_s25, 0 }
 0x18f   : > { %p683_p10 = scmp.ge.s32.totalorder %s471_s15, 2  ;;  %s254_s8 = scalar_lea.sflag [#allocation4], %s253_s6 }
 0x191   : > { %p334_p2 = pnand %p683_p10, %p682_p7 }
 0x193   : > { %454 = dma.done.wait (!%p334_p2), %s254_s8, 128  }
 0x194   : > { %456 = vsyncadd (!%p334_p2), %s254_s8, 4294967168  ;;  %p16_p4 = scmp.ge.s32.totalorder %s520_s18, 4   ;;  %s684_s12 = smov %s463_s13 }
 0x195   : > { %s685_s13 = smov %s467_s14  ;;  %s686_s14 = smov %s532_s21 }
 0x196   : > { %s687_s15 = smov %s520_s18  ;;  %18 = sbr.rel (!%p16_p4) target bundleno = 5 (0x5), region = 77 }
 0x19d   :  { %259 = vsyncpa [#allocation3], 1 }
 0x19e   :  { %261 = vsyncpa [#allocation3 + $0x1], 1 }
 0x19f   :  { %262 = vsyncpa [#allocation4], 1 }
 0x1a0   :  { %264 = vsyncpa [#allocation4 + $0x1], 1 }

</bundles_post_ra>
